<compile_context>
chip_gen: v6e
topology: v6e:2x2x1
jax: 0.10.0
libtpu: 0.0.40
codegen_flags: <defaults>
</compile_context>

<pallas_src>
import math

import jax
import jax.numpy as jnp
from jax.experimental import pallas as pl
from jax.experimental.pallas import tpu as pltpu


_SQRT_2_OVER_PI = math.sqrt(2.0 / math.pi)
_LANE = 128


def _gelu_new_f32(x):
    # tanh-approximate GELU (transformers' gelu_new) in f32 vregs.  tanh lands on
    # the EUP slot; the surrounding VPU muls/adds hide under the MXU.
    x3 = x * x * x
    return 0.5 * x * (1.0 + jnp.tanh(_SQRT_2_OVER_PI * (x + 0.044715 * x3)))


def _ffn_kernel_resident(h_ref, w_ref, b_ref, o_ref):
    # grid = (outer, inner): one operand's block index is constant across the
    # inner sweep (chosen in the wrapper), so it is DMA'd from HBM only once per
    # outer stripe.  No accumulator scratch; bias + GELU fused into the output.
    x = jnp.dot(h_ref[...], w_ref[...], preferred_element_type=jnp.float32)
    x = x + b_ref[...]
    o_ref[...] = _gelu_new_f32(x).astype(o_ref.dtype)


def _ffn_kernel_ksplit(h_ref, w_ref, b_ref, o_ref, acc_ref):
    # grid = (N//tn, M//tm, K//tk); reduction axis innermost and "arbitrary";
    # f32 accumulation in VMEM scratch.
    @pl.when(pl.program_id(2) == 0)
    def _():
        acc_ref[...] = jnp.zeros_like(acc_ref)

    acc_ref[...] += jnp.dot(h_ref[...], w_ref[...],
                            preferred_element_type=jnp.float32)

    @pl.when(pl.program_id(2) == pl.num_programs(2) - 1)
    def _():
        x = acc_ref[...] + b_ref[...]
        o_ref[...] = _gelu_new_f32(x).astype(o_ref.dtype)


def _round_up(x, m):
    return ((x + m - 1) // m) * m


def _vmem_budget_bytes():
    # Chip-aware scoped-VMEM budget: ~5/8 of physical, capped at 48 MiB.
    # v7x (64 MiB physical)  -> ~40 MiB; v5e/v6e (128 MiB) -> 48 MiB.
    try:
        info = pltpu.get_tpu_info()
        cap = int(getattr(info, "vmem_capacity_bytes", 0) or 0)
        if cap > 0:
            return int(min(48 << 20, (cap * 5) // 8))
    except Exception:
        pass
    return 40 << 20


def _pick_tile(dim, granule, target):
    """Pick a tile size for `dim`.

    Prefers a multiple of `granule` that exactly divides the granule-padded dim
    (so no whole-array pad copy is needed) and is close to `target`; falls back
    to padding up to a multiple of `target` only when no reasonable divisor
    exists.  Returns (tile, padded_dim).
    """
    padded = _round_up(dim, granule)
    target = max(granule, _round_up(min(target, padded), granule))
    if padded <= target:
        return padded, padded
    units = padded // granule
    tu = target // granule
    best = 1
    for d in range(1, tu + 1):
        if units % d == 0:
            best = d
    tile = best * granule
    if tile * 2 >= target:
        return tile, padded
    # Ragged dim with no good divisor: pad up to a multiple of the target tile.
    return target, _round_up(padded, target)


def vd_intermediate(h, weight, bias, *, tm=None, tn=None, tk=None,
                    compute_dtype=jnp.bfloat16, out_dtype=None,
                    max_resident_k=4096):
    """gelu_new(h @ W + b)   (VDIntermediate forward).

    h:      [B, S, D]
    weight: [D, N]  (transposed vs torch nn.Linear's [N, D]).  Pass it already
            cast to `compute_dtype` (once, at load time) to avoid a per-call
            HBM cast pass.
    bias:   [N]
    out_dtype: output dtype (default h.dtype); bf16 halves store traffic on v5e
            when the downstream VDOutput matmul consumes bf16 anyway.
    """
    B, S, D = h.shape
    K, N = weight.shape
    if K != D:
        raise ValueError(f"weight first dim {K} != d_model {D}")
    if bias.shape != (N,):
        raise ValueError(f"bias shape {bias.shape} != ({N},)")
    M = B * S
    if out_dtype is None:
        out_dtype = h.dtype

    c_item = jnp.dtype(compute_dtype).itemsize
    o_item = jnp.dtype(out_dtype).itemsize
    # Sublane granule must cover both the (packed) compute-dtype h tile and the
    # output tile; lane granule is 128 for W / bias / output last dims.
    g_m = max(8, 32 // c_item, 32 // o_item)
    g_n = _LANE
    g_k = _LANE

    budget = _vmem_budget_bytes()

    # --- tile selection.  Defaults tm=512 / tn=1024 keep per-grid-step MXU work
    # well above the ~0.35us step overhead on v6e/v7x while the double-buffered
    # working set stays inside the chip-aware VMEM budget.  For typical BERT
    # shapes this also keeps both parallel grid extents even, so v7x's two
    # TensorCores split the work evenly.
    tm, M_pad = _pick_tile(M, g_m, 512 if tm is None else tm)
    tn, N_pad = _pick_tile(N, g_n, 1024 if tn is None else tn)
    K_g = _round_up(K, g_k)

    if tk is None:
        work_res = (2 * (tm * K_g + K_g * tn) * c_item   # h + resident W slabs (x2 buf)
                    + 2 * tn * 4                          # bias
                    + 2 * tm * tn * o_item)               # output tile (x2 buf)
        if K_g <= max_resident_k and work_res <= budget:
            tk, K_pad = K_g, K_g                          # weight/activation-resident path
        else:
            tk, K_pad = _pick_tile(K, g_k, 2048)          # k-split fallback, big tk
    else:
        tk, K_pad = _pick_tile(K, g_k, tk)

    grid_m, grid_n, grid_k = M_pad // tm, N_pad // tn, K_pad // tk

    # --- operand prep: cast only if needed (callers should pre-cast the constant
    # weight once), pad only up to granules / chosen tiles.
    h2 = h.reshape(M, K)
    if h2.dtype != compute_dtype:
        h2 = h2.astype(compute_dtype)
    w2 = weight if weight.dtype == compute_dtype else weight.astype(compute_dtype)
    b2 = bias.astype(jnp.float32).reshape(1, N)
    if M_pad != M or K_pad != K:
        h2 = jnp.pad(h2, ((0, M_pad - M), (0, K_pad - K)))
    if K_pad != K or N_pad != N:
        w2 = jnp.pad(w2, ((0, K_pad - K), (0, N_pad - N)))
    if N_pad != N:
        b2 = jnp.pad(b2, ((0, 0), (0, N_pad - N)))

    # --- VMEM working set actually used (double-buffered) and explicit limit.
    work = (2 * tm * tk * c_item + 2 * tk * tn * c_item
            + 2 * tn * 4 + 2 * tm * tn * o_item)
    if grid_k > 1:
        work += tm * tn * 4
    vmem_limit = int(max(16 << 20,
                         min(budget, work + (work >> 2) + (2 << 20)),
                         work + (1 << 20)))

    h_bytes = M_pad * K_pad * c_item
    w_bytes = K_pad * N_pad * c_item

    if grid_k == 1:
        # Resident path: keep whichever operand would be more expensive to
        # re-fetch as the block whose index is constant across the inner sweep.
        refetch_w_resident = h_bytes * (grid_n - 1)   # h re-read per column stripe
        refetch_h_resident = w_bytes * (grid_m - 1)   # W re-read per row stripe
        if refetch_w_resident <= refetch_h_resident:
            # Weight-resident: j outer, i inner; (K, tn) W slab DMA'd once/stripe.
            grid = (grid_n, grid_m)
            in_specs = [
                pl.BlockSpec((tm, tk), lambda j, i: (i, 0)),   # activations (stream)
                pl.BlockSpec((tk, tn), lambda j, i: (0, j)),   # resident W slab
                pl.BlockSpec((1, tn), lambda j, i: (0, j)),    # bias
            ]
            out_specs = pl.BlockSpec((tm, tn), lambda j, i: (i, j))
            bytes_in = h_bytes * grid_n + w_bytes
        else:
            # Activation-resident: i outer, j inner; (tm, K) h slab DMA'd once/stripe.
            grid = (grid_m, grid_n)
            in_specs = [
                pl.BlockSpec((tm, tk), lambda i, j: (i, 0)),   # resident h slab
                pl.BlockSpec((tk, tn), lambda i, j: (0, j)),   # W streams
                pl.BlockSpec((1, tn), lambda i, j: (0, j)),    # bias
            ]
            out_specs = pl.BlockSpec((tm, tn), lambda i, j: (i, j))
            bytes_in = h_bytes + w_bytes * grid_m
        kernel = _ffn_kernel_resident
        scratch = ()
        dim_sem = ("parallel", "parallel")
    else:
        # k-split path: reduction axis last, f32 accumulator scratch.
        grid = (grid_n, grid_m, grid_k)
        in_specs = [
            pl.BlockSpec((tm, tk), lambda j, i, k: (i, k)),
            pl.BlockSpec((tk, tn), lambda j, i, k: (k, j)),
            pl.BlockSpec((1, tn), lambda j, i, k: (0, j)),
        ]
        out_specs = pl.BlockSpec((tm, tn), lambda j, i, k: (i, j))
        kernel = _ffn_kernel_ksplit
        scratch = (pltpu.VMEM((tm, tn), jnp.float32),)
        dim_sem = ("parallel", "parallel", "arbitrary")
        bytes_in = h_bytes * grid_n + w_bytes * grid_m

    cost = pl.CostEstimate(
        flops=2 * M_pad * N_pad * K_pad,
        transcendentals=M_pad * N_pad,
        bytes_accessed=int(bytes_in + M_pad * N_pad * o_item + N_pad * 4),
    )

    out = pl.pallas_call(
        kernel,
        out_shape=jax.ShapeDtypeStruct((M_pad, N_pad), out_dtype),
        grid_spec=pltpu.PrefetchScalarGridSpec(
            num_scalar_prefetch=0,
            grid=grid,
            in_specs=in_specs,
            out_specs=out_specs,
            scratch_shapes=scratch,
        ),
        compiler_params=pltpu.CompilerParams(
            dimension_semantics=dim_sem,
            vmem_limit_bytes=vmem_limit,
        ),
        cost_estimate=cost,
    )(h2, w2, b2)

    if M_pad != M or N_pad != N:
        out = out[:M, :N]
    return out.reshape(B, S, N)


def _ref_vd_intermediate(h, weight, bias, compute_dtype=jnp.bfloat16):
    # Reference with the same bf16-operand / f32-accumulation numerics.
    B, S, D = h.shape
    x = jnp.dot(h.reshape(B * S, D).astype(compute_dtype),
                weight.astype(compute_dtype),
                preferred_element_type=jnp.float32)
    x = x + bias.astype(jnp.float32)
    return _gelu_new_f32(x).astype(h.dtype).reshape(B, S, -1)


# TODO(synk): the rest of VDModel (attention, LayerNorm, embeddings, prediction
# heads, losses) is not kernelized here; this file implements the VDIntermediate
# FFN (Linear + gelu_new) which is the dominant matmul of each VDLayer.

if __name__ == "__main__":
    key = jax.random.PRNGKey(0)
    k_h, k_w, k_b, k_h2, k_w2, k_b2 = jax.random.split(key, 6)

    # --- Test 1: module-consistent small shapes (resident, no-k-split path);
    # batch=2, seq=8, d_model=32, intermediate_size=64.
    B, S, D, N = 2, 8, 32, 64
    h = jax.random.normal(k_h, (B, S, D), dtype=jnp.float32)
    weight = jax.random.normal(k_w, (D, N), dtype=jnp.float32) * (1.0 / math.sqrt(D))
    bias = jax.random.normal(k_b, (N,), dtype=jnp.float32) * 0.02

    # Hoist the constant weight cast out of the per-call path (done once here).
    weight_bf16 = weight.astype(jnp.bfloat16)

    out = jax.block_until_ready(vd_intermediate(h, weight_bf16, bias))
    ref = _ref_vd_intermediate(h, weight, bias)
    assert out.shape == (B, S, N)
    assert jnp.allclose(out, ref, atol=2e-3, rtol=2e-3), "mismatch (resident path)"

    # --- Test 2: force the k-split accumulator path (tk < K).
    B2, S2, D2, N2 = 2, 8, 256, 256
    h_b = jax.random.normal(k_h2, (B2, S2, D2), dtype=jnp.float32)
    w_b = jax.random.normal(k_w2, (D2, N2), dtype=jnp.float32) * (1.0 / math.sqrt(D2))
    b_b = jax.random.normal(k_b2, (N2,), dtype=jnp.float32) * 0.02

    out2 = jax.block_until_ready(
        vd_intermediate(h_b, w_b.astype(jnp.bfloat16), b_b, tk=128))
    ref2 = _ref_vd_intermediate(h_b, w_b, b_b)
    assert out2.shape == (B2, S2, N2)
    assert jnp.allclose(out2, ref2, atol=2e-3, rtol=2e-3), "mismatch (k-split path)"

    print("KERNEL_OK")
</pallas_src>

<mosaic_0001>
module attributes {stable_mosaic.version = 11 : i64} {
  func.func @_ffn_kernel_resident(%arg0: i32, %arg1: i32, %arg2: memref<16x128xbf16, #tpu.memory_space<vmem>>, %arg3: memref<128x128xbf16, #tpu.memory_space<vmem>>, %arg4: memref<1x128xf32, #tpu.memory_space<vmem>>, %arg5: memref<16x128xf32, #tpu.memory_space<vmem>>) attributes {dimension_semantics = [#tpu.dimension_semantics<parallel>, #tpu.dimension_semantics<parallel>], iteration_bounds = array<i64: 1, 1>, scalar_prefetch = 0 : i64, scratch_operands = 0 : i64, tpu.core_type = #tpu.core_type<tc>, window_params = [{transform_indices = @transform_0, window_bounds = array<i64: 16, 128>}, {transform_indices = @transform_1, window_bounds = array<i64: 128, 128>}, {transform_indices = @transform_2, window_bounds = array<i64: 1, 128>}, {transform_indices = @transform_3, window_bounds = array<i64: 16, 128>}]} {
    %c0 = arith.constant 0 : index
    %c0_0 = arith.constant 0 : index
    %0 = vector.load %arg2[%c0, %c0_0] : memref<16x128xbf16, #tpu.memory_space<vmem>>, vector<16x128xbf16>
    %c0_1 = arith.constant 0 : index
    %c0_2 = arith.constant 0 : index
    %1 = vector.load %arg3[%c0_1, %c0_2] : memref<128x128xbf16, #tpu.memory_space<vmem>>, vector<128x128xbf16>
    %cst = arith.constant dense<0.000000e+00> : vector<16x128xf32>
    %2 = tpu.matmul %0, %1, %cst {dimension_numbers = #tpu.dot_dimension_numbers<[1], [0], [0], [1], [0, 0, 1, 1], [], []>} : vector<16x128xbf16>, vector<128x128xbf16>, vector<16x128xf32> -> vector<16x128xf32>
    %c0_3 = arith.constant 0 : index
    %c0_4 = arith.constant 0 : index
    %3 = vector.load %arg4[%c0_3, %c0_4] : memref<1x128xf32, #tpu.memory_space<vmem>>, vector<1x128xf32>
    %4 = vector.broadcast %3 : vector<1x128xf32> to vector<16x128xf32>
    %5 = arith.addf %2, %4 : vector<16x128xf32>
    %6 = arith.mulf %5, %5 : vector<16x128xf32>
    %7 = arith.mulf %6, %5 : vector<16x128xf32>
    %cst_5 = arith.constant 5.000000e-01 : f32
    %8 = vector.broadcast %cst_5 : f32 to vector<16x128xf32>
    %9 = arith.mulf %8, %5 : vector<16x128xf32>
    %cst_6 = arith.constant 4.471500e-02 : f32
    %10 = vector.broadcast %cst_6 : f32 to vector<16x128xf32>
    %11 = arith.mulf %10, %7 : vector<16x128xf32>
    %12 = arith.addf %5, %11 : vector<16x128xf32>
    %cst_7 = arith.constant 0.797884583 : f32
    %13 = vector.broadcast %cst_7 : f32 to vector<16x128xf32>
    %14 = arith.mulf %13, %12 : vector<16x128xf32>
    %15 = math.tanh %14 : vector<16x128xf32>
    %cst_8 = arith.constant 1.000000e+00 : f32
    %16 = vector.broadcast %cst_8 : f32 to vector<16x128xf32>
    %17 = arith.addf %16, %15 : vector<16x128xf32>
    %18 = arith.mulf %9, %17 : vector<16x128xf32>
    %c0_9 = arith.constant 0 : index
    %c0_10 = arith.constant 0 : index
    %19 = vector.load %arg5[%c0_9, %c0_10] : memref<16x128xf32, #tpu.memory_space<vmem>>, vector<16x128xf32>
    tpu.vector_store %arg5[%c0_9, %c0_10], %18 {strides = array<i32>} : memref<16x128xf32, #tpu.memory_space<vmem>>, vector<16x128xf32>,
    return
  }
  func.func @transform_0(%arg0: i32, %arg1: i32) -> (i32, i32) {
    %c0_i32 = arith.constant 0 : i32
    %c0_i32_0 = arith.constant 0 : i32
    return %arg1, %c0_i32 : i32, i32
  }
  func.func @transform_1(%arg0: i32, %arg1: i32) -> (i32, i32) {
    %c0_i32 = arith.constant 0 : i32
    %c0_i32_0 = arith.constant 0 : i32
    return %c0_i32, %arg0 : i32, i32
  }
  func.func @transform_2(%arg0: i32, %arg1: i32) -> (i32, i32) {
    %c0_i32 = arith.constant 0 : i32
    %c0_i32_0 = arith.constant 0 : i32
    return %c0_i32, %arg0 : i32, i32
  }
  func.func @transform_3(%arg0: i32, %arg1: i32) -> (i32, i32) {
    %c0_i32 = arith.constant 0 : i32
    return %arg1, %arg0 : i32, i32
  }
}

</mosaic_0001>

<bundles_post_ra>
// kernel: tpu_custom_call.1
= control target key start
LH: loop header
LB: loop body
LE: loop exit
PB: predicated region body
PF: predicated region fallthrough
CT: control target
= control target key end

     0   :  { %8 = vsyncpa [#allocation3], 0  ;;  %s370_s0 = inlined_call_operand.hbm [shape: bf16[16,128], index: 0, kind: input, shape index: {}]   ;;  %s371_s1 = inlined_call_operand.hbm [shape: bf16[128,128], index: 1, kind: input, shape index: {}]   ;;  %s372_s2 = inlined_call_operand.vmem [shape: f32[1,128], index: 2, kind: input, shape index: {}]   ;;  %s373_s3 = inlined_call_operand.hbm [shape: f32[16,128], index: 3, kind: output, shape index: {}]  }
   0x1   :  { %9 = vsyncpa [#allocation6], 0 }
   0x2   :  { %10 = vsyncpa [#allocation4], 0  ;;  %s329_s12 = smov [#allocation2]  }
   0x3   :  { %s16_s13 = sshll.u32 %s329_s12, 4  ;;  %s17_s13 = int_to_ptr.vmem [resolvable:$true] %s16_s13 }
   0x4   :  { %s271_s14 = scalar_lea.vmem %s17_s13, 128  ;;  %p276_p1 = scmp.lt.s32.totalorder %s17_s13, %s17_s13 }
   0x5   :  { %p272_p0 = scmp.ne.s32.totalorder %s17_s13, %s271_s14  ;;  %p277_p2 = scmp.lt.s32.totalorder %s271_s14, %s271_s14 }
   0x7   :  { %p278_p3 = por %p277_p2, %p276_p1 }
   0x9   :  { %p279_p4 = pnand %p278_p3, %p272_p0 }
   0xb   :  { %282 = shalt.err (!%p279_p4)
}
   0xc   :  { %s330_s15 = smov 64   ;;  %s331_s16 = smov 4  }
   0xd   :  { %22 = dma.hbm_to_vmem [thread:$0]  %s370_s0, 128, %s17_s13, [#allocation3], %s330_s15, %s330_s15, %s331_s16  }
   0xe   :  { %s332_s19 = smov [#allocation5]  }
   0xf   :  { %s28_s20 = sshll.u32 %s332_s19, 4  ;;  %s29_s20 = int_to_ptr.vmem [resolvable:$true] %s28_s20 }
  0x10   :  { %s291_s21 = scalar_lea.vmem %s29_s20, 1024  ;;  %p296_p6 = scmp.lt.s32.totalorder %s29_s20, %s29_s20 }
  0x11   :  { %p292_p5 = scmp.ne.s32.totalorder %s29_s20, %s291_s21  ;;  %p297_p7 = scmp.lt.s32.totalorder %s291_s21, %s291_s21 }
  0x13   :  { %p298_p8 = por %p297_p7, %p296_p6 }
  0x15   :  { %p299_p9 = pnand %p298_p8, %p292_p5 }
  0x17   :  { %302 = shalt.err (!%p299_p9)
}
  0x18   :  { %34 = dma.hbm_to_vmem [thread:$0]  %s371_s1, 1024, %s29_s20, [#allocation6], %s330_s15, %s330_s15, %s331_s16  }
  0x19   :  { %323 = dma.done.wait [#allocation3], 128  }
  0x1a   :  { %324 = vsyncadd [#allocation3], 4294967168 }
  0x1b   :  { %325 = dma.done.wait [#allocation6], 1024  }
  0x1c   :  { %326 = vsyncadd [#allocation6], 4294966272  ;;  %v333_v0 = vmov 0.0   ;;  %vm334_vm0 = vmmov 0   ;;  %v250_v1 = vld [vmem:[#allocation5 + $0x38] sm:$0xff]   ;;  %v251_v2 = vld [vmem:[#allocation5 + $0x30] sm:$0xff]  }
  0x1d   :  { %221 = vmatprep.subr.bf16.mxu0 %v333_v0  ;;  %237 = vmatprep.mubr.msk.bf16.mxu0 %vm334_vm0, %v333_v0  ;;  %v252_v3 = vld [vmem:[#allocation5 + $0x28] sm:$0xff]   ;;  %v253_v4 = vld [vmem:[#allocation5 + $0x20] sm:$0xff]   ;;  %v254_v5 = vld [vmem:[#allocation5 + $0x18] sm:$0xff]  }
  0x1e   :  { %222 = vmatpush3.bf16.msra.mxu0 %v250_v1  ;;  %v255_v6 = vld [vmem:[#allocation5 + $0x10] sm:$0xff]   ;;  %v256_v7 = vld [vmem:[#allocation5 + $0x8] sm:$0xff]   ;;  %v257_v8 = vld [vmem:[#allocation5] sm:$0xff]  }
  0x1f   :  { %223 = vmatprep.subr.bf16.mxu0 %v333_v0  ;;  %v258_v9 = vld [vmem:[#allocation2] sm:$0xff]  }
  0x20   :  { %v202_v10 = vld [vmem:[%s372_s2] ss:$0 sm:$0xff]  ;;  %s335_s2 = smov [#allocation7]  }
  0x21   :  { %s189_s24 = sshll.u32 %s335_s2, 4  ;;  %s190_s24 = int_to_ptr.vmem [resolvable:$true] %s189_s24 }
  0x22   :  { %224 = vmatpush3.bf16.msra.mxu0 %v251_v2  ;;  %s303_s25 = scalar_lea.vmem %s190_s24, 256  ;;  %p308_p11 = scmp.lt.s32.totalorder %s190_s24, %s190_s24 }
  0x23   :  { %225 = vmatprep.subr.bf16.mxu0 %v333_v0  ;;  %p304_p10 = scmp.ne.s32.totalorder %s190_s24, %s303_s25  ;;  %p309_p12 = scmp.lt.s32.totalorder %s303_s25, %s303_s25 }
  0x25   :  { %p310_p13 = por %p309_p12, %p308_p11 }
  0x26   :  { %226 = vmatpush3.bf16.msra.mxu0 %v252_v3 }
  0x27   :  { %227 = vmatprep.subr.bf16.mxu0 %v333_v0  ;;  %p311_p0 = pnand %p310_p13, %p304_p10 }
  0x2a   :  { %228 = vmatpush3.bf16.msra.mxu0 %v253_v4 }
  0x2b   :  { %229 = vmatprep.subr.bf16.mxu0 %v333_v0 }
  0x2e   :  { %230 = vmatpush3.bf16.msra.mxu0 %v254_v5 }
  0x2f   :  { %231 = vmatprep.subr.bf16.mxu0 %v333_v0 }
  0x32   :  { %232 = vmatpush3.bf16.msra.mxu0 %v255_v6 }
  0x33   :  { %233 = vmatprep.subr.bf16.mxu0 %v333_v0 }
  0x36   :  { %234 = vmatpush3.bf16.msra.mxu0 %v256_v7 }
  0x37   :  { %235 = vmatprep.subr.bf16.mxu0 %v333_v0 }
  0x3a   :  { %236 = vmatpush3.bf16.msra.mxu0 %v257_v8 }
  0x3d   :  { %238 = vmatmul.mubr.bf16.vlgmr.msra.gmra.mxu0 %v258_v9 }
  0xfd   :  { %v157_v11 = vpop.f32.mrf.mxu0 }
  0xfe   :  { %v158_v12 = vadd.f32 %v202_v10, %v157_v11 }
  0xff   :  { %v239_v13 = vpop.f32.mrf.mxu0 }
 0x100   :  { %v164_v14 = vmul.f32 %v158_v12, %v158_v12  ;;  %v168_v28 = vmul.f32 0.5, %v158_v12 }
 0x101   :  { %v160_v15 = vpop.f32.mrf.mxu0 }
 0x102   :  { %v166_v16 = vmul.f32 %v164_v14, %v158_v12  ;;  %v161_v17 = vadd.f32 %v202_v10, %v160_v15 }
 0x103   :  { %v240_v18 = vpop.f32.mrf.mxu0 }
 0x104   :  { %v170_v19 = vmul.f32 0.044715, %v166_v16  ;;  %v165_v20 = vmul.f32 %v161_v17, %v161_v17  ;;  %v169_v32 = vmul.f32 0.5, %v161_v17 }
 0x106   :  { %v172_v21 = vadd.f32 %v170_v19, %v158_v12  ;;  %v167_v22 = vmul.f32 %v165_v20, %v161_v17 }
 0x108   :  { %v174_v23 = vmul.f32 0.7978846, %v172_v21  ;;  %v171_v24 = vmul.f32 0.044715, %v167_v22 }
 0x10a   :  { %259 = vtanh.f32 %v174_v23  ;;  %v173_v25 = vadd.f32 %v171_v24, %v161_v17 }
 0x10c   :  { %v175_v26 = vmul.f32 0.7978846, %v173_v25 }
 0x10e   :  { %261 = vtanh.f32 %v175_v26 }
 0x117   :  { %v260_v27 = vpop.eup %259 }
 0x118   :  { %v178_v29 = vadd.f32 1.0, %v260_v27 }
 0x11a   :  { %v180_v30 = vmul.f32 %v178_v29, %v168_v28 }
 0x11b   :  { %v262_v31 = vpop.eup %261 }
 0x11c   :  { %v179_v33 = vadd.f32 1.0, %v262_v31  ;;  %182 = vst [vmem:[#allocation7] sm:$0xff] %v180_v30 }
 0x11e   :  { %v181_v34 = vmul.f32 %v179_v33, %v169_v32 }
 0x120   :  { %183 = vst [vmem:[#allocation7 + $0x8] sm:$0xff] %v181_v34 }
 0x121   :  { %314 = shalt.err (!%p311_p0)
}
 0x122   :  { %s336_s26 = smov 128   ;;  %s337_s27 = smov 8  }
 0x123   :  { %195 = dma.vmem_to_hbm [thread:$0]  %s190_s24, 256, %s373_s3, [#allocation4], %s336_s26, %s336_s26, %s337_s27  }
 0x124   :  { %327 = dma.done.wait [#allocation4], 256  }
 0x125   :  { %328 = vsyncadd [#allocation4], 4294967040 }
 0x126   :  { %199 = vsyncpa [#allocation3], 1 }
 0x127   :  { %200 = vsyncpa [#allocation6], 1 }
 0x128   :  { %201 = vsyncpa [#allocation4], 1 }

</bundles_post_ra>
